<compile_context>
chip_gen: v7x
topology: tpu7x:2x2x1
jax: 0.10.0
libtpu: 0.0.40
codegen_flags: <defaults>
</compile_context>

<pallas_src>
import functools

import jax
import jax.numpy as jnp
from jax.experimental import pallas as pl
from jax.experimental.pallas import tpu as pltpu


def _round_up(n: int, m: int) -> int:
    return ((n + m - 1) // m) * m


def _decoder_kernel(z_ref, w1_ref, b1_ref, w2_ref, b2_ref, out_ref, *, approx_sigmoid):
    # Layer 1: Linear(z_dim -> h_dim) + ReLU.  MXU matmul with f32 accumulation.
    a = z_ref[...].astype(w1_ref.dtype)            # cast to MXU operand dtype in-kernel (no wrapper pass)
    h = jnp.dot(a, w1_ref[...], preferred_element_type=jnp.float32)
    h = jnp.maximum(h + b1_ref[...], 0.0)          # bias/ReLU in f32 on the VPU; b1 is (1, Hp)
    # Layer 2: Linear(h_dim -> x_dim) + Sigmoid.
    o = jnp.dot(h.astype(w2_ref.dtype), w2_ref[...], preferred_element_type=jnp.float32)
    o = o + b2_ref[...]                             # b2 is (1, Xp), f32
    if approx_sigmoid:
        # sigmoid(x) = 1 / (1 + exp(-x)); exp and the approximate reciprocal both run on
        # the EUP slot, keeping the VALU free for the bias/ReLU/cast work (kernel is
        # epilogue-bound at these tiny feature dims).
        s = pl.reciprocal(1.0 + jnp.exp(-o), approx=True)
    else:
        s = jax.nn.sigmoid(o)
    out_ref[...] = s.astype(out_ref.dtype)


def prepare_params(w1, b1, w2, b2, *, compute_dtype=jnp.float32):
    """Pad feature dims to 128-lane multiples and cast to the MXU operand dtype ONCE.

    Call this outside the per-step hot path and reuse the result; it avoids re-writing
    both weight matrices to HBM on every decoder invocation.

    Shapes: w1 [z_dim, h_dim], b1 [1, h_dim] (or [h_dim]), w2 [h_dim, x_dim], b2 [1, x_dim].
    Returns (w1p [z_dim, Hp], b1p [1, Hp] f32, w2p [Hp, Xp], b2p [1, Xp] f32).
    Note: w1's K dim (z_dim) is intentionally left unpadded so z never needs feature padding.
    """
    z_dim, h_dim = w1.shape
    x_dim = w2.shape[1]
    Hp = _round_up(h_dim, 128)
    Xp = _round_up(x_dim, 128)
    w1p = jnp.pad(w1, ((0, 0), (0, Hp - h_dim))).astype(compute_dtype)
    b1p = jnp.pad(jnp.reshape(b1, (1, h_dim)), ((0, 0), (0, Hp - h_dim))).astype(jnp.float32)
    w2p = jnp.pad(w2, ((0, Hp - h_dim), (0, Xp - x_dim))).astype(compute_dtype)
    b2p = jnp.pad(jnp.reshape(b2, (1, x_dim)), ((0, 0), (0, Xp - x_dim))).astype(jnp.float32)
    return w1p, b1p, w2p, b2p


@functools.partial(
    jax.jit, static_argnames=("x_dim", "block_b", "out_dtype", "approx_sigmoid")
)
def simple_decoder(z, w1p, b1p, w2p, b2p, *, x_dim, block_b=512,
                   out_dtype=jnp.float32, approx_sigmoid=True):
    """Fused decoder forward.  z: [B, z_dim]; w*/b* from prepare_params().  Returns [B, x_dim]."""
    B, zk = z.shape
    assert w1p.shape[0] == zk, "w1 must be [z_dim, Hp] from prepare_params"
    Hp = w1p.shape[1]
    Xp = w2p.shape[1]
    assert w2p.shape[0] == Hp and b1p.shape == (1, Hp) and b2p.shape == (1, Xp)
    assert x_dim <= Xp

    c_item = jnp.dtype(w1p.dtype).itemsize
    o_item = jnp.dtype(out_dtype).itemsize
    z_item = jnp.dtype(z.dtype).itemsize

    # ---- Batch tiling: sublane minimum covers every packed dtype in play. ----
    sub = max(8, 32 // min(c_item, o_item, z_item))
    B_sub = _round_up(B, sub)
    if B_sub <= block_b:
        TB = B_sub                                   # single grid step: no pipeline overhead
    else:
        n_steps = max(pl.cdiv(B_sub, block_b), 4)    # >=2 steps per TensorCore once we split (v7x)
        TB = _round_up(pl.cdiv(B_sub, n_steps), sub)
    B_pad = _round_up(B_sub, TB)
    grid = (B_pad // TB,)

    # ---- Explicit VMEM budget (weights single-buffered, activations double-buffered). ----
    weight_bytes = (zk * Hp + Hp * Xp) * c_item + (Hp + Xp) * 4
    act_bytes = 2 * TB * zk * z_item + 2 * TB * Xp * o_item
    scratch_bytes = TB * (Hp + Xp) * 4               # f32 intermediates headroom
    vmem_need = weight_bytes + act_bytes + scratch_bytes
    if vmem_need > (40 << 20):
        # TODO(synk): add a second grid axis tiling Xp (w2/b2/out blocks (Hp, TN)) for very
        # large h_dim*x_dim so weights need not be fully resident (v7x has 64 MiB VMEM).
        raise ValueError("decoder layer too large to keep weights fully VMEM-resident")
    vmem_limit = int(min(max(vmem_need + (vmem_need // 2) + (4 << 20), 16 << 20), 48 << 20))

    # ---- Only pad the batch when needed (z feature dim is consumed at full extent). ----
    z_in = z if B_pad == B else jnp.pad(z, ((0, B_pad - B), (0, 0)))

    cost = pl.CostEstimate(
        flops=2 * B_pad * (zk * Hp + Hp * Xp),
        transcendentals=2 * B_pad * Xp,              # exp + reciprocal per output element
        bytes_accessed=(B_pad * zk * z_item + (zk * Hp + Hp * Xp) * c_item
                        + (Hp + Xp) * 4 + B_pad * Xp * o_item),
    )

    kernel = functools.partial(_decoder_kernel, approx_sigmoid=approx_sigmoid)

    resident = dict(pipeline_mode=pl.Buffered(1))    # grid-constant operands: single buffer
    out_padded = pl.pallas_call(
        kernel,
        out_shape=jax.ShapeDtypeStruct((B_pad, Xp), out_dtype),
        grid=grid,
        in_specs=[
            pl.BlockSpec((TB, zk), lambda i: (i, 0)),            # activation tile moves with grid
            pl.BlockSpec((zk, Hp), lambda i: (0, 0), **resident),  # weights resident across steps
            pl.BlockSpec((1, Hp), lambda i: (0, 0), **resident),
            pl.BlockSpec((Hp, Xp), lambda i: (0, 0), **resident),
            pl.BlockSpec((1, Xp), lambda i: (0, 0), **resident),
        ],
        out_specs=pl.BlockSpec((TB, Xp), lambda i: (i, 0)),
        compiler_params=pltpu.CompilerParams(
            dimension_semantics=("parallel",),                    # megacore sharding on v7x
            vmem_limit_bytes=vmem_limit,
        ),
        cost_estimate=cost,
    )(z_in, w1p, b1p, w2p, b2p)

    if B_pad != B or Xp != x_dim:
        out_padded = out_padded[:B, :x_dim]
    return out_padded


def init_params(key, x_dim, z_dim, h_dim):
    """Deterministic init mimicking nn.Linear's uniform(-1/sqrt(fan_in), 1/sqrt(fan_in))."""
    k1, k2, k3, k4 = jax.random.split(key, 4)
    bound1 = 1.0 / jnp.sqrt(z_dim)
    bound2 = 1.0 / jnp.sqrt(h_dim)
    w1 = jax.random.uniform(k1, (z_dim, h_dim), jnp.float32, -bound1, bound1)
    b1 = jax.random.uniform(k2, (1, h_dim), jnp.float32, -bound1, bound1)
    w2 = jax.random.uniform(k3, (h_dim, x_dim), jnp.float32, -bound2, bound2)
    b2 = jax.random.uniform(k4, (1, x_dim), jnp.float32, -bound2, bound2)
    return w1, b1, w2, b2


def reference(z, w1, b1, w2, b2):
    h = jnp.maximum(z @ w1 + b1, 0.0)
    return jax.nn.sigmoid(h @ w2 + b2)


if __name__ == "__main__":
    # Small shapes consistent with the module's forward: z is [batch, z_dim].
    B, z_dim, h_dim, x_dim = 256, 16, 32, 64

    key = jax.random.PRNGKey(0)
    kz, kp = jax.random.split(key)
    z = jax.random.normal(kz, (B, z_dim), jnp.float32)
    w1, b1, w2, b2 = init_params(kp, x_dim, z_dim, h_dim)

    ref = reference(z, w1, b1, w2, b2)

    # f32 MXU operands, exact sigmoid: tight numerical check vs. the pure-JAX reference.
    pf32 = prepare_params(w1, b1, w2, b2, compute_dtype=jnp.float32)
    out_exact = jax.block_until_ready(
        simple_decoder(z, *pf32, x_dim=x_dim, approx_sigmoid=False))
    assert out_exact.shape == (B, x_dim)
    assert jnp.allclose(out_exact, ref, atol=1e-5, rtol=1e-5), "f32 exact mismatch vs reference"

    # f32 operands with the default EUP-approximate sigmoid (perf path).
    out_f32 = jax.block_until_ready(simple_decoder(z, *pf32, x_dim=x_dim))
    assert out_f32.shape == (B, x_dim)
    assert jnp.allclose(out_f32, ref, atol=5e-3), "f32 approx-sigmoid mismatch vs reference"

    # bf16 MXU operands (f32 accumulation + f32 epilogue), bf16 writeback.
    pbf16 = prepare_params(w1, b1, w2, b2, compute_dtype=jnp.bfloat16)
    out_bf16 = jax.block_until_ready(
        simple_decoder(z, *pbf16, x_dim=x_dim, out_dtype=jnp.bfloat16))
    assert out_bf16.shape == (B, x_dim)
    assert jnp.allclose(out_bf16.astype(jnp.float32), ref, atol=2.5e-2), \
        "bf16 mismatch vs reference"

    print("KERNEL_OK")
</pallas_src>

<mosaic_0001>
module attributes {stable_mosaic.version = 11 : i64} {
  func.func @_decoder_kernel(%arg0: i32, %arg1: memref<256x16xf32, #tpu.memory_space<vmem>>, %arg2: memref<16x128xf32, #tpu.memory_space<vmem>>, %arg3: memref<1x128xf32, #tpu.memory_space<vmem>>, %arg4: memref<128x128xf32, #tpu.memory_space<vmem>>, %arg5: memref<1x128xf32, #tpu.memory_space<vmem>>, %arg6: memref<256x128xf32, #tpu.memory_space<vmem>>) attributes {dimension_semantics = [#tpu.dimension_semantics<parallel>], iteration_bounds = array<i64: 1>, scalar_prefetch = 0 : i64, scratch_operands = 0 : i64, tpu.core_type = #tpu.core_type<tc>, window_params = [{transform_indices = @transform_0, window_bounds = array<i64: 256, 16>}, {pipeline_mode = #tpu.pipeline_mode<synchronous>, transform_indices = @transform_1, window_bounds = array<i64: 16, 128>}, {pipeline_mode = #tpu.pipeline_mode<synchronous>, transform_indices = @transform_2, window_bounds = array<i64: 1, 128>}, {pipeline_mode = #tpu.pipeline_mode<synchronous>, transform_indices = @transform_3, window_bounds = array<i64: 128, 128>}, {pipeline_mode = #tpu.pipeline_mode<synchronous>, transform_indices = @transform_4, window_bounds = array<i64: 1, 128>}, {transform_indices = @transform_5, window_bounds = array<i64: 256, 128>}]} {
    %c0 = arith.constant 0 : index
    %c0_0 = arith.constant 0 : index
    %0 = vector.load %arg1[%c0, %c0_0] : memref<256x16xf32, #tpu.memory_space<vmem>>, vector<256x16xf32>
    %c0_1 = arith.constant 0 : index
    %c0_2 = arith.constant 0 : index
    %1 = vector.load %arg2[%c0_1, %c0_2] : memref<16x128xf32, #tpu.memory_space<vmem>>, vector<16x128xf32>
    %cst = arith.constant dense<0.000000e+00> : vector<256x128xf32>
    %2 = tpu.matmul %0, %1, %cst {dimension_numbers = #tpu.dot_dimension_numbers<[1], [0], [0], [1], [0, 0, 1, 1], [], []>} : vector<256x16xf32>, vector<16x128xf32>, vector<256x128xf32> -> vector<256x128xf32>
    %c0_3 = arith.constant 0 : index
    %c0_4 = arith.constant 0 : index
    %3 = vector.load %arg3[%c0_3, %c0_4] : memref<1x128xf32, #tpu.memory_space<vmem>>, vector<1x128xf32>
    %4 = vector.broadcast %3 : vector<1x128xf32> to vector<256x128xf32>
    %5 = arith.addf %2, %4 : vector<256x128xf32>
    %cst_5 = arith.constant 0.000000e+00 : f32
    %6 = vector.broadcast %cst_5 : f32 to vector<256x128xf32>
    %7 = arith.maximumf %5, %6 : vector<256x128xf32>
    %c0_6 = arith.constant 0 : index
    %c0_7 = arith.constant 0 : index
    %8 = vector.load %arg4[%c0_6, %c0_7] : memref<128x128xf32, #tpu.memory_space<vmem>>, vector<128x128xf32>
    %cst_8 = arith.constant dense<0.000000e+00> : vector<256x128xf32>
    %9 = tpu.matmul %7, %8, %cst_8 {dimension_numbers = #tpu.dot_dimension_numbers<[1], [0], [0], [1], [0, 0, 1, 1], [], []>} : vector<256x128xf32>, vector<128x128xf32>, vector<256x128xf32> -> vector<256x128xf32>
    %c0_9 = arith.constant 0 : index
    %c0_10 = arith.constant 0 : index
    %10 = vector.load %arg5[%c0_9, %c0_10] : memref<1x128xf32, #tpu.memory_space<vmem>>, vector<1x128xf32>
    %11 = vector.broadcast %10 : vector<1x128xf32> to vector<256x128xf32>
    %12 = arith.addf %9, %11 : vector<256x128xf32>
    %13 = arith.negf %12 : vector<256x128xf32>
    %14 = math.exp %13 : vector<256x128xf32>
    %cst_11 = arith.constant 1.000000e+00 : f32
    %15 = vector.broadcast %cst_11 : f32 to vector<256x128xf32>
    %16 = arith.addf %15, %14 : vector<256x128xf32>
    %17 = arith.divf %15, %16 : vector<256x128xf32>
    %c0_12 = arith.constant 0 : index
    %c0_13 = arith.constant 0 : index
    %18 = vector.load %arg6[%c0_12, %c0_13] : memref<256x128xf32, #tpu.memory_space<vmem>>, vector<256x128xf32>
    tpu.vector_store %arg6[%c0_12, %c0_13], %17 {strides = array<i32>} : memref<256x128xf32, #tpu.memory_space<vmem>>, vector<256x128xf32>,
    return
  }
  func.func @transform_0(%arg0: i32) -> (i32, i32) {
    %c0_i32 = arith.constant 0 : i32
    %c0_i32_0 = arith.constant 0 : i32
    return %arg0, %c0_i32 : i32, i32
  }
  func.func @transform_1(%arg0: i32) -> (i32, i32) {
    %c0_i32 = arith.constant 0 : i32
    %c0_i32_0 = arith.constant 0 : i32
    %c0_i32_1 = arith.constant 0 : i32
    return %c0_i32, %c0_i32_0 : i32, i32
  }
  func.func @transform_2(%arg0: i32) -> (i32, i32) {
    %c0_i32 = arith.constant 0 : i32
    %c0_i32_0 = arith.constant 0 : i32
    %c0_i32_1 = arith.constant 0 : i32
    return %c0_i32, %c0_i32_0 : i32, i32
  }
  func.func @transform_3(%arg0: i32) -> (i32, i32) {
    %c0_i32 = arith.constant 0 : i32
    %c0_i32_0 = arith.constant 0 : i32
    %c0_i32_1 = arith.constant 0 : i32
    return %c0_i32, %c0_i32_0 : i32, i32
  }
  func.func @transform_4(%arg0: i32) -> (i32, i32) {
    %c0_i32 = arith.constant 0 : i32
    %c0_i32_0 = arith.constant 0 : i32
    %c0_i32_1 = arith.constant 0 : i32
    return %c0_i32, %c0_i32_0 : i32, i32
  }
  func.func @transform_5(%arg0: i32) -> (i32, i32) {
    %c0_i32 = arith.constant 0 : i32
    %c0_i32_0 = arith.constant 0 : i32
    return %arg0, %c0_i32 : i32, i32
  }
}

</mosaic_0001>

<bundles_post_ra>
// kernel: simple_decoder.1
= control target key start
LH: loop header
LB: loop body
LE: loop exit
PB: predicated region body
PF: predicated region fallthrough
CT: control target
= control target key end

     0   :  { %vm61_vm0 = vcmask 130048   ;;  %s1733_s1 = inlined_call_operand.vmem [shape: f32[16,128], index: 1, kind: input, shape index: {}]   ;;  %s1734_s0 = inlined_call_operand.vmem [shape: f32[256,16], index: 0, kind: input, shape index: {}]   ;;  %s1735_s3 = inlined_call_operand.vmem [shape: f32[128,128], index: 3, kind: input, shape index: {}]   ;;  %s1736_s2 = inlined_call_operand.vmem [shape: f32[1,128], index: 2, kind: input, shape index: {}]   ;;  %s1737_s4 = inlined_call_operand.vmem [shape: f32[1,128], index: 4, kind: input, shape index: {}]   ;;  %s1738_s5 = inlined_call_operand.vmem [shape: f32[256,128], index: 5, kind: output, shape index: {}]  }
   0x1   :  { %v52_v0 = vld [vmem:[%s1733_s1] sm:$0xff]  ;;  %v53_v1 = vld [vmem:[%s1733_s1 + $0x8] sm:$0xff]  ;;  %v22_v5 = vld [vmem:[%s1734_s0 + $0x10] sm:$0xff] }
   0x2   :  { %v20_v2 = vld [vmem:[%s1734_s0] sm:$0xff]  ;;  %v1171_v3 = vpack.c.bf16 %v53_v1, %v52_v0  ;;  %v21_v4 = vld [vmem:[%s1734_s0 + $0x8] sm:$0xff]  ;;  %v23_v6 = vld [vmem:[%s1734_s0 + $0x18] sm:$0xff] }
   0x3   :  { %1043 = vmatprep.mubr.msk.f32.mxu0 %vm61_vm0, %v20_v2  ;;  %v24_v7 = vld [vmem:[%s1734_s0 + $0x20] sm:$0xff]  ;;  %v416_v9 = vld [vmem:[%s1735_s3 + $0x8] sm:$0xff]  ;;  %v417_v12 = vld [vmem:[%s1735_s3 + $0x10] sm:$0xff] }
   0x4   :  { %1172 = vmatprep.subr.bf16.mxu0 %v1171_v3  ;;  %v415_v8 = vld [vmem:[%s1735_s3] sm:$0xff]  ;;  %v25_v10 = vld [vmem:[%s1734_s0 + $0x28] sm:$0xff]  ;;  %v418_v13 = vld [vmem:[%s1735_s3 + $0x18] sm:$0xff] }
   0x5   :  { %1174 = vmatpush3.bf16.msra.mxu0 %v1171_v3  ;;  %v1175_v11 = vpack.c.bf16 %v416_v9, %v415_v8  ;;  %v26_v14 = vld [vmem:[%s1734_s0 + $0x30] sm:$0xff]  ;;  %v1179_v15 = vpack.c.bf16 %v418_v13, %v417_v12  ;;  %v419_v16 = vld [vmem:[%s1735_s3 + $0x20] sm:$0xff]  ;;  %v420_v17 = vld [vmem:[%s1735_s3 + $0x28] sm:$0xff] }
   0x6   :  { %v27_v18 = vld [vmem:[%s1734_s0 + $0x38] sm:$0xff]  ;;  %v28_v19 = vld [vmem:[%s1734_s0 + $0x40] sm:$0xff]  ;;  %v1183_v20 = vpack.c.bf16 %v420_v17, %v419_v16  ;;  %v421_v21 = vld [vmem:[%s1735_s3 + $0x30] sm:$0xff] }
   0x7   :  { %1176 = vmatprep.subr.bf16.mxu0 %v1175_v11  ;;  %1207 = vmatprep.subr.bf16.mxu1 %v1175_v11  ;;  %v422_v22 = vld [vmem:[%s1735_s3 + $0x38] sm:$0xff]  ;;  %v29_v23 = vld [vmem:[%s1734_s0 + $0x48] sm:$0xff]  ;;  %v30_v24 = vld [vmem:[%s1734_s0 + $0x50] sm:$0xff] }
   0x8   :  { %1044 = vmatmul.mubr.msk.f32.vlgmr.msra.gmra.mrb[0].mxu0 %vm61_vm0, %v21_v4  ;;  %1215 = vmatpush3.bf16.msra.mxu1 %v1175_v11  ;;  %v1187_v25 = vpack.c.bf16 %v422_v22, %v421_v21  ;;  %v423_v26 = vld [vmem:[%s1735_s3 + $0x40] sm:$0xff]  ;;  %v424_v27 = vld [vmem:[%s1735_s3 + $0x48] sm:$0xff]  ;;  %v31_v28 = vld [vmem:[%s1734_s0 + $0x58] sm:$0xff] }
   0x9   :  { %1046 = vmatprep.mubr.msk.f32.mxu0 %vm61_vm0, %v22_v5  ;;  %1178 = vmatpush3.bf16.msra.mxu0 %v1175_v11  ;;  %v32_v29 = vld [vmem:[%s1734_s0 + $0x60] sm:$0xff]  ;;  %v1191_v30 = vpack.c.bf16 %v424_v27, %v423_v26  ;;  %v425_v31 = vld [vmem:[%s1735_s3 + $0x50] sm:$0xff]  ;;  %v426_v32 = vld [vmem:[%s1735_s3 + $0x58] sm:$0xff] }
   0xa   :  { %1180 = vmatprep.subr.bf16.mxu0 %v1179_v15  ;;  %1208 = vmatprep.subr.bf16.mxu1 %v1179_v15  ;;  %v33_v33 = vld [vmem:[%s1734_s0 + $0x68] sm:$0xff]  ;;  %v34_v34 = vld [vmem:[%s1734_s0 + $0x70] sm:$0xff]  ;;  %v1195_v35 = vpack.c.bf16 %v426_v32, %v425_v31  ;;  %v427_v36 = vld [vmem:[%s1735_s3 + $0x60] sm:$0xff] }
   0xb   :  { %v428_v37 = vld [vmem:[%s1735_s3 + $0x68] sm:$0xff]  ;;  %v35_v38 = vld [vmem:[%s1734_s0 + $0x78] sm:$0xff]  ;;  %v36_v39 = vld [vmem:[%s1734_s0 + $0x80] sm:$0xff] }
   0xc   :  { %1047 = vmatmul.mubr.msk.f32.gmra.mrb[2].mxu0 %vm61_vm0, %v23_v6  ;;  %1216 = vmatpush3.bf16.msra.mxu1 %v1179_v15  ;;  %v1199_v40 = vpack.c.bf16 %v428_v37, %v427_v36  ;;  %v37_v41 = vld [vmem:[%s1734_s0 + $0x88] sm:$0xff]  ;;  %v38_v42 = vld [vmem:[%s1734_s0 + $0x90] sm:$0xff]  ;;  %v39_v43 = vld [vmem:[%s1734_s0 + $0x98] sm:$0xff] }
   0xd   :  { %1049 = vmatprep.mubr.msk.f32.mxu0 %vm61_vm0, %v24_v7  ;;  %1182 = vmatpush3.bf16.msra.mxu0 %v1179_v15  ;;  %v40_v44 = vld [vmem:[%s1734_s0 + $0xa0] sm:$0xff]  ;;  %v41_v45 = vld [vmem:[%s1734_s0 + $0xa8] sm:$0xff]  ;;  %v42_v46 = vld [vmem:[%s1734_s0 + $0xb0] sm:$0xff] }
   0xe   :  { %1184 = vmatprep.subr.bf16.mxu0 %v1183_v20  ;;  %1209 = vmatprep.subr.bf16.mxu1 %v1183_v20  ;;  %v43_v47 = vld [vmem:[%s1734_s0 + $0xb8] sm:$0xff]  ;;  %v44_v48 = vld [vmem:[%s1734_s0 + $0xc0] sm:$0xff]  ;;  %v45_v49 = vld [vmem:[%s1734_s0 + $0xc8] sm:$0xff] }
   0xf   :  { %v46_v50 = vld [vmem:[%s1734_s0 + $0xd0] sm:$0xff]  ;;  %v47_v51 = vld [vmem:[%s1734_s0 + $0xd8] sm:$0xff]  ;;  %v48_v52 = vld [vmem:[%s1734_s0 + $0xe0] sm:$0xff] }
  0x10   :  { %1050 = vmatmul.mubr.msk.f32.gmra.mrb[4].mxu0 %vm61_vm0, %v25_v10  ;;  %1217 = vmatpush3.bf16.msra.mxu1 %v1183_v20  ;;  %v49_v53 = vld [vmem:[%s1734_s0 + $0xe8] sm:$0xff]  ;;  %v50_v54 = vld [vmem:[%s1734_s0 + $0xf0] sm:$0xff]  ;;  %v51_v55 = vld [vmem:[%s1734_s0 + $0xf8] sm:$0xff] }
  0x11   :  { %1052 = vmatprep.mubr.msk.f32.mxu0 %vm61_vm0, %v26_v14  ;;  %1186 = vmatpush3.bf16.msra.mxu0 %v1183_v20  ;;  %v429_v56 = vld [vmem:[%s1735_s3 + $0x70] sm:$0xff]  ;;  %v430_v57 = vld [vmem:[%s1735_s3 + $0x78] sm:$0xff]  ;;  %v1566_v59 = vld [vmem:[%s1736_s2] ss:$0 sm:$0xff] }
  0x12   :  { %1188 = vmatprep.subr.bf16.mxu0 %v1187_v25  ;;  %1210 = vmatprep.subr.bf16.mxu1 %v1187_v25  ;;  %v1203_v58 = vpack.c.bf16 %v430_v57, %v429_v56 }
  0x14   :  { %1053 = vmatmul.mubr.msk.f32.gmra.mrb[6].mxu0 %vm61_vm0, %v27_v18  ;;  %1218 = vmatpush3.bf16.msra.mxu1 %v1187_v25 }
  0x15   :  { %1055 = vmatprep.mubr.msk.f32.mxu0 %vm61_vm0, %v28_v19  ;;  %1190 = vmatpush3.bf16.msra.mxu0 %v1187_v25 }
  0x16   :  { %1192 = vmatprep.subr.bf16.mxu0 %v1191_v30  ;;  %1211 = vmatprep.subr.bf16.mxu1 %v1191_v30 }
  0x18   :  { %1056 = vmatmul.mubr.msk.f32.gmra.mrb[8].mxu0 %vm61_vm0, %v29_v23  ;;  %1219 = vmatpush3.bf16.msra.mxu1 %v1191_v30 }
  0x19   :  { %1058 = vmatprep.mubr.msk.f32.mxu0 %vm61_vm0, %v30_v24  ;;  %1194 = vmatpush3.bf16.msra.mxu0 %v1191_v30 }
  0x1a   :  { %1196 = vmatprep.subr.bf16.mxu0 %v1195_v35  ;;  %1212 = vmatprep.subr.bf16.mxu1 %v1195_v35 }
  0x1c   :  { %1059 = vmatmul.mubr.msk.f32.gmra.mrb[10].mxu0 %vm61_vm0, %v31_v28  ;;  %1220 = vmatpush3.bf16.msra.mxu1 %v1195_v35 }
  0x1d   :  { %1061 = vmatprep.mubr.msk.f32.mxu0 %vm61_vm0, %v32_v29  ;;  %1198 = vmatpush3.bf16.msra.mxu0 %v1195_v35 }
  0x1e   :  { %1200 = vmatprep.subr.bf16.mxu0 %v1199_v40  ;;  %1213 = vmatprep.subr.bf16.mxu1 %v1199_v40 }
  0x20   :  { %1062 = vmatmul.mubr.msk.f32.gmra.mrb[12].mxu0 %vm61_vm0, %v33_v33  ;;  %1221 = vmatpush3.bf16.msra.mxu1 %v1199_v40 }
  0x21   :  { %1064 = vmatprep.mubr.msk.f32.mxu0 %vm61_vm0, %v34_v34  ;;  %1202 = vmatpush3.bf16.msra.mxu0 %v1199_v40 }
  0x22   :  { %1204 = vmatprep.subr.bf16.mxu0 %v1203_v58  ;;  %1214 = vmatprep.subr.bf16.mxu1 %v1203_v58 }
  0x24   :  { %1065 = vmatmul.mubr.msk.f32.gmra.mrb[14].mxu0 %vm61_vm0, %v35_v38  ;;  %1222 = vmatpush3.bf16.msra.mxu1 %v1203_v58 }
  0x25   :  { %1067 = vmatprep.mubr.msk.f32.mxu0 %vm61_vm0, %v36_v39  ;;  %1206 = vmatpush3.bf16.msra.mxu0 %v1203_v58 }
  0x28   :  { %1068 = vmatmul.mubr.msk.f32.gmra.mrb[16].mxu0 %vm61_vm0, %v37_v41 }
  0x29   :  { %1070 = vmatprep.mubr.msk.f32.mxu0 %vm61_vm0, %v38_v42 }
  0x2c   :  { %1071 = vmatmul.mubr.msk.f32.gmra.mrb[18].mxu0 %vm61_vm0, %v39_v43 }
  0x2d   :  { %1073 = vmatprep.mubr.msk.f32.mxu0 %vm61_vm0, %v40_v44 }
  0x30   :  { %1074 = vmatmul.mubr.msk.f32.gmra.mrb[20].mxu0 %vm61_vm0, %v41_v45 }
  0x31   :  { %1076 = vmatprep.mubr.msk.f32.mxu0 %vm61_vm0, %v42_v46 }
  0x34   :  { %1077 = vmatmul.mubr.msk.f32.gmra.mrb[22].mxu0 %vm61_vm0, %v43_v47 }
  0x35   :  { %1079 = vmatprep.mubr.msk.f32.mxu0 %vm61_vm0, %v44_v48 }
  0x38   :  { %1080 = vmatmul.mubr.msk.f32.gmra.mrb[24].mxu0 %vm61_vm0, %v45_v49 }
  0x39   :  { %1082 = vmatprep.mubr.msk.f32.mxu0 %vm61_vm0, %v46_v50 }
  0x3c   :  { %1083 = vmatmul.mubr.msk.f32.gmra.mrb[26].mxu0 %vm61_vm0, %v47_v51 }
  0x3d   :  { %1085 = vmatprep.mubr.msk.f32.mxu0 %vm61_vm0, %v48_v52 }
  0x40   :  { %1086 = vmatmul.mubr.msk.f32.gmra.mrb[28].mxu0 %vm61_vm0, %v49_v53 }
  0x41   :  { %1088 = vmatprep.mubr.msk.f32.mxu0 %vm61_vm0, %v50_v54 }
  0x44   :  { %1089 = vmatmul.mubr.msk.f32.gmra.mrb[30].mxu0 %vm61_vm0, %v51_v55 }
  0xdb   :  { %v1045_v60 = vpop.f32.mrb[0].mxu0 }
  0xdc   :  { %v230_v61 = vadd.f32 %v1045_v60, %v1566_v59  ;;  %v224_v62 = vpop.f32.mrb[1].mxu0 }
  0xdd   :  { %v225_v63 = vadd.f32 %v1566_v59, %v224_v62 }
  0xde   :  { %v384_v2 = vmax.f32 %v230_v61, 0.0 }
  0xdf   :  { %v383_v0 = vmax.f32 %v225_v63, 0.0  ;;  %v1048_v1 = vpop.f32.mrb[2].mxu0 }
  0xe0   :  { %v240_v3 = vadd.f32 %v1048_v1, %v1566_v59  ;;  %v234_v4 = vpop.f32.mrb[3].mxu0 }
  0xe1   :  { %v235_v5 = vadd.f32 %v1566_v59, %v234_v4  ;;  %1123 = vmatprep.mubr.f32.mxu0 %v383_v0 }
  0xe2   :  { %1124 = vmatmul.mubr.f32.vlgmr.msra.gmra.mrb[32].mxu0 %v384_v2  ;;  %v386_v8 = vmax.f32 %v240_v3, 0.0 }
  0xe3   :  { %v385_v6 = vmax.f32 %v235_v5, 0.0  ;;  %v1051_v7 = vpop.f32.mrb[4].mxu0 }
  0xe4   :  { %v250_v9 = vadd.f32 %v1051_v7, %v1566_v59  ;;  %v244_v10 = vpop.f32.mrb[5].mxu0 }
  0xe5   :  { %v245_v11 = vadd.f32 %v1566_v59, %v244_v10  ;;  %1126 = vmatprep.mubr.f32.mxu0 %v385_v6 }
  0xe6   :  { %1127 = vmatmul.mubr.f32.gmra.mrb[34].mxu0 %v386_v8  ;;  %v388_v14 = vmax.f32 %v250_v9, 0.0 }
  0xe7   :  { %v387_v12 = vmax.f32 %v245_v11, 0.0  ;;  %v1054_v13 = vpop.f32.mrb[6].mxu0 }
  0xe8   :  { %v260_v15 = vadd.f32 %v1054_v13, %v1566_v59  ;;  %v254_v16 = vpop.f32.mrb[7].mxu0 }
  0xe9   :  { %1129 = vmatprep.mubr.f32.mxu0 %v387_v12  ;;  %v255_v17 = vadd.f32 %v1566_v59, %v254_v16 }
  0xea   :  { %1130 = vmatmul.mubr.f32.gmra.mrb[36].mxu0 %v388_v14  ;;  %v390_v20 = vmax.f32 %v260_v15, 0.0 }
  0xeb   :  { %v1057_v18 = vpop.f32.mrb[8].mxu0  ;;  %v389_v19 = vmax.f32 %v255_v17, 0.0 }
  0xec   :  { %v270_v21 = vadd.f32 %v1057_v18, %v1566_v59  ;;  %v264_v22 = vpop.f32.mrb[9].mxu0 }
  0xed   :  { %v265_v23 = vadd.f32 %v1566_v59, %v264_v22  ;;  %1132 = vmatprep.mubr.f32.mxu1 %v389_v19 }
  0xee   :  { %1133 = vmatmul.mubr.f32.vlgmr.msra.gmra.mrb[0].mxu1 %v390_v20  ;;  %v392_v26 = vmax.f32 %v270_v21, 0.0 }
  0xef   :  { %v391_v24 = vmax.f32 %v265_v23, 0.0  ;;  %v1060_v25 = vpop.f32.mrb[10].mxu0 }
  0xf0   :  { %v280_v27 = vadd.f32 %v1060_v25, %v1566_v59  ;;  %v274_v28 = vpop.f32.mrb[11].mxu0 }
  0xf1   :  { %v275_v29 = vadd.f32 %v1566_v59, %v274_v28  ;;  %1135 = vmatprep.mubr.f32.mxu1 %v391_v24 }
  0xf2   :  { %1136 = vmatmul.mubr.f32.gmra.mrb[2].mxu1 %v392_v26  ;;  %v394_v32 = vmax.f32 %v280_v27, 0.0 }
  0xf3   :  { %v393_v30 = vmax.f32 %v275_v29, 0.0  ;;  %v1063_v31 = vpop.f32.mrb[12].mxu0  ;;  %v1603_v29 = vld [vmem:[%s1737_s4] ss:$0 sm:$0xff] }
  0xf4   :  { %v290_v33 = vadd.f32 %v1063_v31, %v1566_v59  ;;  %v284_v34 = vpop.f32.mrb[13].mxu0 }
  0xf5   :  { %v285_v35 = vadd.f32 %v1566_v59, %v284_v34  ;;  %1138 = vmatprep.mubr.f32.mxu1 %v393_v30 }
  0xf6   :  { %1139 = vmatmul.mubr.f32.gmra.mrb[4].mxu1 %v394_v32  ;;  %v396_v38 = vmax.f32 %v290_v33, 0.0 }
  0xf7   :  { %v395_v36 = vmax.f32 %v285_v35, 0.0  ;;  %v1066_v37 = vpop.f32.mrb[14].mxu0 }
  0xf8   :  { %v300_v39 = vadd.f32 %v1066_v37, %v1566_v59  ;;  %v294_v40 = vpop.f32.mrb[15].mxu0 }
  0xf9   :  { %v295_v41 = vadd.f32 %v1566_v59, %v294_v40  ;;  %1141 = vmatprep.mubr.f32.mxu1 %v395_v36 }
  0xfa   :  { %1142 = vmatmul.mubr.f32.gmra.mrb[6].mxu1 %v396_v38  ;;  %v398_v44 = vmax.f32 %v300_v39, 0.0 }
  0xfb   :  { %v397_v42 = vmax.f32 %v295_v41, 0.0  ;;  %v1069_v43 = vpop.f32.mrb[16].mxu0 }
  0xfc   :  { %v310_v45 = vadd.f32 %v1069_v43, %v1566_v59  ;;  %v304_v46 = vpop.f32.mrb[17].mxu0 }
  0xfd   :  { %v305_v47 = vadd.f32 %v1566_v59, %v304_v46  ;;  %1144 = vmatprep.mubr.f32.mxu1 %v397_v42 }
  0xfe   :  { %1145 = vmatmul.mubr.f32.gmra.mrb[8].mxu1 %v398_v44  ;;  %v400_v50 = vmax.f32 %v310_v45, 0.0 }
  0xff   :  { %v399_v48 = vmax.f32 %v305_v47, 0.0  ;;  %v1072_v49 = vpop.f32.mrb[18].mxu0 }
 0x100   :  { %v320_v51 = vadd.f32 %v1072_v49, %v1566_v59  ;;  %v314_v52 = vpop.f32.mrb[19].mxu0 }
 0x101   :  { %v315_v53 = vadd.f32 %v1566_v59, %v314_v52  ;;  %1147 = vmatprep.mubr.f32.mxu1 %v399_v48 }
 0x102   :  { %1148 = vmatmul.mubr.f32.gmra.mrb[10].mxu1 %v400_v50  ;;  %v402_v56 = vmax.f32 %v320_v51, 0.0 }
 0x103   :  { %v401_v54 = vmax.f32 %v315_v53, 0.0  ;;  %v1075_v55 = vpop.f32.mrb[20].mxu0 }
 0x104   :  { %v330_v57 = vadd.f32 %v1075_v55, %v1566_v59  ;;  %v324_v58 = vpop.f32.mrb[21].mxu0 }
 0x105   :  { %v325_v60 = vadd.f32 %v1566_v59, %v324_v58  ;;  %1150 = vmatprep.mubr.f32.mxu1 %v401_v54 }
 0x106   :  { %1151 = vmatmul.mubr.f32.gmra.mrb[12].mxu1 %v402_v56  ;;  %v404_v63 = vmax.f32 %v330_v57, 0.0 }
 0x107   :  { %v403_v61 = vmax.f32 %v325_v60, 0.0  ;;  %v1078_v62 = vpop.f32.mrb[22].mxu0 }
 0x108   :  { %v340_v0 = vadd.f32 %v1078_v62, %v1566_v59  ;;  %v334_v1 = vpop.f32.mrb[23].mxu0 }
 0x109   :  { %v335_v2 = vadd.f32 %v1566_v59, %v334_v1  ;;  %1153 = vmatprep.mubr.f32.mxu1 %v403_v61 }
 0x10a   :  { %1154 = vmatmul.mubr.f32.gmra.mrb[14].mxu1 %v404_v63  ;;  %v406_v5 = vmax.f32 %v340_v0, 0.0 }
 0x10b   :  { %v405_v3 = vmax.f32 %v335_v2, 0.0  ;;  %v1081_v4 = vpop.f32.mrb[24].mxu0 }
 0x10c   :  { %v350_v6 = vadd.f32 %v1081_v4, %v1566_v59  ;;  %v344_v7 = vpop.f32.mrb[25].mxu0 }
 0x10d   :  { %v345_v8 = vadd.f32 %v1566_v59, %v344_v7  ;;  %1156 = vmatprep.mubr.f32.mxu1 %v405_v3 }
 0x10e   :  { %1157 = vmatmul.mubr.f32.gmra.mrb[16].mxu1 %v406_v5  ;;  %v408_v11 = vmax.f32 %v350_v6, 0.0 }
 0x10f   :  { %v407_v9 = vmax.f32 %v345_v8, 0.0  ;;  %v1084_v10 = vpop.f32.mrb[26].mxu0 }
 0x110   :  { %v360_v12 = vadd.f32 %v1084_v10, %v1566_v59  ;;  %v354_v13 = vpop.f32.mrb[27].mxu0 }
 0x111   :  { %v355_v14 = vadd.f32 %v1566_v59, %v354_v13  ;;  %1159 = vmatprep.mubr.f32.mxu1 %v407_v9 }
 0x112   :  { %1160 = vmatmul.mubr.f32.gmra.mrb[18].mxu1 %v408_v11  ;;  %v410_v17 = vmax.f32 %v360_v12, 0.0 }
 0x113   :  { %v409_v15 = vmax.f32 %v355_v14, 0.0  ;;  %v1087_v16 = vpop.f32.mrb[28].mxu0 }
 0x114   :  { %v370_v18 = vadd.f32 %v1087_v16, %v1566_v59  ;;  %v364_v19 = vpop.f32.mrb[29].mxu0 }
 0x115   :  { %v365_v20 = vadd.f32 %v1566_v59, %v364_v19  ;;  %1162 = vmatprep.mubr.f32.mxu1 %v409_v15 }
 0x116   :  { %1163 = vmatmul.mubr.f32.gmra.mrb[20].mxu1 %v410_v17  ;;  %v412_v23 = vmax.f32 %v370_v18, 0.0 }
 0x117   :  { %v411_v21 = vmax.f32 %v365_v20, 0.0  ;;  %v1090_v22 = vpop.f32.mrb[30].mxu0 }
 0x118   :  { %v380_v24 = vadd.f32 %v1090_v22, %v1566_v59  ;;  %v374_v25 = vpop.f32.mrb[31].mxu0 }
 0x119   :  { %v375_v26 = vadd.f32 %v1566_v59, %v374_v25  ;;  %1165 = vmatprep.mubr.f32.mxu1 %v411_v21 }
 0x11a   :  { %1166 = vmatmul.mubr.f32.gmra.mrb[22].mxu1 %v412_v23  ;;  %v414_v28 = vmax.f32 %v380_v24, 0.0 }
 0x11b   :  { %v413_v27 = vmax.f32 %v375_v26, 0.0 }
 0x11d   :  { %1168 = vmatprep.mubr.f32.mxu1 %v413_v27 }
 0x11e   :  { %1169 = vmatmul.mubr.f32.gmra.mrb[24].mxu1 %v414_v28 }
 0x1b5   :  { %v1125_v30 = vpop.f32.mrb[32].mxu0 }
 0x1b6   :  { %v510_v31 = vadd.f32 %v1125_v30, %v1603_v29  ;;  %v504_v32 = vpop.f32.mrb[33].mxu0 }
 0x1b7   :  { %v505_v33 = vadd.f32 %v1603_v29, %v504_v32 }
 0x1b8   :  { %v926_v34 = vmul.f32 -1.442695, %v510_v31 }
 0x1b9   :  { %v925_v35 = vmul.f32 -1.442695, %v505_v33  ;;  %v1128_v59 = vpop.f32.mrb[34].mxu0 }
 0x1ba   :  { %1223 = vpow2.f32 %v926_v34  ;;  %v520_v36 = vadd.f32 %v1128_v59, %v1603_v29  ;;  %v514_v37 = vpop.f32.mrb[35].mxu0 }
 0x1bb   :  { %1225 = vpow2.f32 %v925_v35  ;;  %v515_v38 = vadd.f32 %v1603_v29, %v514_v37 }
 0x1bc   :  { %v928_v39 = vmul.f32 -1.442695, %v520_v36 }
 0x1bd   :  { %v927_v40 = vmul.f32 -1.442695, %v515_v38  ;;  %v1131_v41 = vpop.f32.mrb[36].mxu0 }
 0x1be   :  { %1227 = vpow2.f32 %v928_v39  ;;  %v530_v42 = vadd.f32 %v1131_v41, %v1603_v29  ;;  %v524_v43 = vpop.f32.mrb[37].mxu0 }
 0x1bf   :  { %1229 = vpow2.f32 %v927_v40  ;;  %v525_v44 = vadd.f32 %v1603_v29, %v524_v43 }
 0x1c0   :  { %v930_v45 = vmul.f32 -1.442695, %v530_v42 }
 0x1c1   :  { %v929_v46 = vmul.f32 -1.442695, %v525_v44  ;;  %v1134_v47 = vpop.f32.mrb[0].mxu1 }
 0x1c2   :  { %1231 = vpow2.f32 %v930_v45  ;;  %v540_v48 = vadd.f32 %v1134_v47, %v1603_v29  ;;  %v534_v49 = vpop.f32.mrb[1].mxu1 }
 0x1c3   :  { %1233 = vpow2.f32 %v929_v46  ;;  %v535_v50 = vadd.f32 %v1603_v29, %v534_v49 }
 0x1c4   :  { %v1224_v51 = vpop.eup %1223  ;;  %v932_v52 = vmul.f32 -1.442695, %v540_v48 }
 0x1c5   :  { %v1226_v53 = vpop.eup %1225  ;;  %v760_v54 = vadd.f32 1.0, %v1224_v51  ;;  %v931_v55 = vmul.f32 -1.442695, %v535_v50  ;;  %v1137_v56 = vpop.f32.mrb[2].mxu1 }
 0x1c6   :  { %v759_v57 = vadd.f32 1.0, %v1226_v53  ;;  %1235 = vpow2.f32 %v932_v52  ;;  %v550_v58 = vadd.f32 %v1137_v56, %v1603_v29  ;;  %v544_v60 = vpop.f32.mrb[3].mxu1 }
 0x1c7   :  { %1237 = vrcp.f32 %v760_v54  ;;  %v545_v61 = vadd.f32 %v1603_v29, %v544_v60 }
 0x1c8   :  { %v1228_v62 = vpop.eup %1227  ;;  %1239 = vrcp.f32 %v759_v57  ;;  %v934_v63 = vmul.f32 -1.442695, %v550_v58 }
 0x1c9   :  { %v1230_v0 = vpop.eup %1229  ;;  %v762_v1 = vadd.f32 1.0, %v1228_v62  ;;  %1241 = vpow2.f32 %v931_v55  ;;  %v933_v2 = vmul.f32 -1.442695, %v545_v61  ;;  %v1140_v3 = vpop.f32.mrb[4].mxu1 }
 0x1ca   :  { %v761_v4 = vadd.f32 1.0, %v1230_v0  ;;  %1243 = vpow2.f32 %v934_v63  ;;  %v560_v5 = vadd.f32 %v1140_v3, %v1603_v29  ;;  %v554_v6 = vpop.f32.mrb[5].mxu1 }
 0x1cb   :  { %1245 = vrcp.f32 %v762_v1  ;;  %v555_v7 = vadd.f32 %v1603_v29, %v554_v6 }
 0x1cc   :  { %v1232_v8 = vpop.eup %1231  ;;  %1247 = vrcp.f32 %v761_v4  ;;  %v936_v9 = vmul.f32 -1.442695, %v560_v5 }
 0x1cd   :  { %v1234_v10 = vpop.eup %1233  ;;  %v764_v11 = vadd.f32 1.0, %v1232_v8  ;;  %1249 = vpow2.f32 %v933_v2  ;;  %v935_v12 = vmul.f32 -1.442695, %v555_v7  ;;  %v1143_v13 = vpop.f32.mrb[6].mxu1 }
 0x1ce   :  { %v763_v14 = vadd.f32 1.0, %v1234_v10  ;;  %1251 = vpow2.f32 %v936_v9  ;;  %v570_v15 = vadd.f32 %v1143_v13, %v1603_v29  ;;  %v564_v16 = vpop.f32.mrb[7].mxu1 }
 0x1cf   :  { %1253 = vrcp.f32 %v764_v11  ;;  %v565_v17 = vadd.f32 %v1603_v29, %v564_v16 }
 0x1d0   :  { %v1236_v18 = vpop.eup %1235  ;;  %1255 = vrcp.f32 %v763_v14  ;;  %v938_v19 = vmul.f32 -1.442695, %v570_v15 }
 0x1d1   :  { %v1238_v20 = vpop.eup %1237  ;;  %v766_v21 = vadd.f32 1.0, %v1236_v18  ;;  %1257 = vpow2.f32 %v935_v12  ;;  %v937_v22 = vmul.f32 -1.442695, %v565_v17  ;;  %v1146_v23 = vpop.f32.mrb[8].mxu1 }
 0x1d2   :  { %v1240_v24 = vpop.eup %1239  ;;  %856 = vst [vmem:[%s1738_s5 + $0x8] sm:$0xff] %v1238_v20  ;;  %1259 = vpow2.f32 %v938_v19  ;;  %v580_v25 = vadd.f32 %v1146_v23, %v1603_v29  ;;  %v574_v26 = vpop.f32.mrb[9].mxu1 }
 0x1d3   :  { %v1242_v27 = vpop.eup %1241  ;;  %855 = vst [vmem:[%s1738_s5] sm:$0xff] %v1240_v24  ;;  %1261 = vrcp.f32 %v766_v21  ;;  %v575_v28 = vadd.f32 %v1603_v29, %v574_v26 }
 0x1d4   :  { %v1244_v30 = vpop.eup %1243  ;;  %v765_v31 = vadd.f32 1.0, %v1242_v27  ;;  %1263 = vpow2.f32 %v937_v22  ;;  %v940_v32 = vmul.f32 -1.442695, %v580_v25 }
 0x1d5   :  { %v1246_v33 = vpop.eup %1245  ;;  %v768_v34 = vadd.f32 1.0, %v1244_v30  ;;  %v939_v35 = vmul.f32 -1.442695, %v575_v28  ;;  %v1149_v59 = vpop.f32.mrb[10].mxu1 }
 0x1d6   :  { %v1248_v36 = vpop.eup %1247  ;;  %858 = vst [vmem:[%s1738_s5 + $0x18] sm:$0xff] %v1246_v33  ;;  %1265 = vrcp.f32 %v765_v31  ;;  %v590_v37 = vadd.f32 %v1149_v59, %v1603_v29  ;;  %v584_v38 = vpop.f32.mrb[11].mxu1 }
 0x1d7   :  { %v1250_v39 = vpop.eup %1249  ;;  %857 = vst [vmem:[%s1738_s5 + $0x10] sm:$0xff] %v1248_v36  ;;  %1267 = vrcp.f32 %v768_v34  ;;  %v585_v40 = vadd.f32 %v1603_v29, %v584_v38 }
 0x1d8   :  { %v1252_v41 = vpop.eup %1251  ;;  %v767_v42 = vadd.f32 1.0, %v1250_v39  ;;  %1269 = vpow2.f32 %v940_v32  ;;  %v942_v43 = vmul.f32 -1.442695, %v590_v37 }
 0x1d9   :  { %v1254_v44 = vpop.eup %1253  ;;  %v770_v45 = vadd.f32 1.0, %v1252_v41  ;;  %1271 = vpow2.f32 %v939_v35  ;;  %v941_v46 = vmul.f32 -1.442695, %v585_v40  ;;  %v1152_v47 = vpop.f32.mrb[12].mxu1 }
 0x1da   :  { %v1256_v48 = vpop.eup %1255  ;;  %860 = vst [vmem:[%s1738_s5 + $0x28] sm:$0xff] %v1254_v44  ;;  %1273 = vrcp.f32 %v767_v42  ;;  %v600_v49 = vadd.f32 %v1152_v47, %v1603_v29  ;;  %v594_v50 = vpop.f32.mrb[13].mxu1 }
 0x1db   :  { %v1258_v51 = vpop.eup %1257  ;;  %859 = vst [vmem:[%s1738_s5 + $0x20] sm:$0xff] %v1256_v48  ;;  %1275 = vrcp.f32 %v770_v45  ;;  %v595_v52 = vadd.f32 %v1603_v29, %v594_v50 }
 0x1dc   :  { %v1260_v53 = vpop.eup %1259  ;;  %v769_v54 = vadd.f32 1.0, %v1258_v51  ;;  %1277 = vpow2.f32 %v942_v43  ;;  %v944_v55 = vmul.f32 -1.442695, %v600_v49 }
 0x1dd   :  { %v1262_v56 = vpop.eup %1261  ;;  %v772_v57 = vadd.f32 1.0, %v1260_v53  ;;  %1279 = vpow2.f32 %v941_v46  ;;  %v1155_v58 = vpop.f32.mrb[14].mxu1  ;;  %v943_v61 = vmul.f32 -1.442695, %v595_v52 }
 0x1de   :  { %v1264_v60 = vpop.eup %1263  ;;  %862 = vst [vmem:[%s1738_s5 + $0x38] sm:$0xff] %v1262_v56  ;;  %1281 = vrcp.f32 %v769_v54  ;;  %v610_v62 = vadd.f32 %v1155_v58, %v1603_v29  ;;  %v604_v63 = vpop.f32.mrb[15].mxu1 }
 0x1df   :  { %1283 = vrcp.f32 %v772_v57  ;;  %v771_v0 = vadd.f32 1.0, %v1264_v60  ;;  %v605_v1 = vadd.f32 %v1603_v29, %v604_v63 }
 0x1e0   :  { %v1266_v2 = vpop.eup %1265  ;;  %1285 = vpow2.f32 %v944_v55  ;;  %v946_v3 = vmul.f32 -1.442695, %v610_v62 }
 0x1e1   :  { %v1268_v4 = vpop.eup %1267  ;;  %861 = vst [vmem:[%s1738_s5 + $0x30] sm:$0xff] %v1266_v2  ;;  %1287 = vrcp.f32 %v771_v0  ;;  %v945_v5 = vmul.f32 -1.442695, %v605_v1  ;;  %v1158_v6 = vpop.f32.mrb[16].mxu1 }
 0x1e2   :  { %v1270_v7 = vpop.eup %1269  ;;  %864 = vst [vmem:[%s1738_s5 + $0x48] sm:$0xff] %v1268_v4  ;;  %1289 = vpow2.f32 %v943_v61  ;;  %v620_v8 = vadd.f32 %v1158_v6, %v1603_v29  ;;  %v614_v9 = vpop.f32.mrb[17].mxu1 }
 0x1e3   :  { %v1272_v10 = vpop.eup %1271  ;;  %v774_v11 = vadd.f32 1.0, %v1270_v7  ;;  %1291 = vpow2.f32 %v946_v3  ;;  %v615_v12 = vadd.f32 %v1603_v29, %v614_v9 }
 0x1e4   :  { %v1274_v13 = vpop.eup %1273  ;;  %v773_v14 = vadd.f32 1.0, %v1272_v10  ;;  %1293 = vpow2.f32 %v945_v5  ;;  %v948_v15 = vmul.f32 -1.442695, %v620_v8 }
 0x1e5   :  { %v1276_v16 = vpop.eup %1275  ;;  %863 = vst [vmem:[%s1738_s5 + $0x40] sm:$0xff] %v1274_v13  ;;  %1295 = vrcp.f32 %v774_v11  ;;  %v947_v17 = vmul.f32 -1.442695, %v615_v12  ;;  %v1161_v18 = vpop.f32.mrb[18].mxu1 }
 0x1e6   :  { %v1278_v19 = vpop.eup %1277  ;;  %866 = vst [vmem:[%s1738_s5 + $0x58] sm:$0xff] %v1276_v16  ;;  %1297 = vrcp.f32 %v773_v14  ;;  %v630_v20 = vadd.f32 %v1161_v18, %v1603_v29  ;;  %v624_v21 = vpop.f32.mrb[19].mxu1 }
 0x1e7   :  { %v1280_v22 = vpop.eup %1279  ;;  %v776_v23 = vadd.f32 1.0, %v1278_v19  ;;  %1299 = vpow2.f32 %v948_v15  ;;  %v625_v24 = vadd.f32 %v1603_v29, %v624_v21 }
 0x1e8   :  { %v1282_v25 = vpop.eup %1281  ;;  %v775_v26 = vadd.f32 1.0, %v1280_v22  ;;  %1301 = vpow2.f32 %v947_v17  ;;  %v950_v27 = vmul.f32 -1.442695, %v630_v20 }
 0x1e9   :  { %v1284_v28 = vpop.eup %1283  ;;  %865 = vst [vmem:[%s1738_s5 + $0x50] sm:$0xff] %v1282_v25  ;;  %1303 = vrcp.f32 %v776_v23  ;;  %v949_v30 = vmul.f32 -1.442695, %v625_v24  ;;  %v1164_v31 = vpop.f32.mrb[20].mxu1 }
 0x1ea   :  { %v1286_v32 = vpop.eup %1285  ;;  %868 = vst [vmem:[%s1738_s5 + $0x68] sm:$0xff] %v1284_v28  ;;  %1305 = vrcp.f32 %v775_v26  ;;  %v640_v33 = vadd.f32 %v1164_v31, %v1603_v29  ;;  %v634_v34 = vpop.f32.mrb[21].mxu1 }
 0x1eb   :  { %v1288_v35 = vpop.eup %1287  ;;  %v778_v59 = vadd.f32 1.0, %v1286_v32  ;;  %1307 = vpow2.f32 %v950_v27  ;;  %v635_v36 = vadd.f32 %v1603_v29, %v634_v34 }
 0x1ec   :  { %v1290_v37 = vpop.eup %1289  ;;  %867 = vst [vmem:[%s1738_s5 + $0x60] sm:$0xff] %v1288_v35  ;;  %1309 = vpow2.f32 %v949_v30  ;;  %v952_v38 = vmul.f32 -1.442695, %v640_v33 }
 0x1ed   :  { %v1292_v39 = vpop.eup %1291  ;;  %1311 = vrcp.f32 %v778_v59  ;;  %v777_v40 = vadd.f32 1.0, %v1290_v37  ;;  %v1167_v41 = vpop.f32.mrb[22].mxu1  ;;  %v951_v44 = vmul.f32 -1.442695, %v635_v36 }
 0x1ee   :  { %v1294_v42 = vpop.eup %1293  ;;  %v780_v43 = vadd.f32 1.0, %v1292_v39  ;;  %1313 = vpow2.f32 %v952_v38  ;;  %v650_v45 = vadd.f32 %v1167_v41, %v1603_v29  ;;  %v644_v46 = vpop.f32.mrb[23].mxu1 }
 0x1ef   :  { %v1296_v47 = vpop.eup %1295  ;;  %1315 = vrcp.f32 %v777_v40  ;;  %v779_v48 = vadd.f32 1.0, %v1294_v42  ;;  %v645_v49 = vadd.f32 %v1603_v29, %v644_v46 }
 0x1f0   :  { %v1298_v50 = vpop.eup %1297  ;;  %870 = vst [vmem:[%s1738_s5 + $0x78] sm:$0xff] %v1296_v47  ;;  %1317 = vrcp.f32 %v780_v43  ;;  %v954_v51 = vmul.f32 -1.442695, %v650_v45 }
 0x1f1   :  { %v1300_v52 = vpop.eup %1299  ;;  %869 = vst [vmem:[%s1738_s5 + $0x70] sm:$0xff] %v1298_v50  ;;  %1319 = vrcp.f32 %v779_v48  ;;  %v1170_v53 = vpop.f32.mrb[24].mxu1  ;;  %v953_v56 = vmul.f32 -1.442695, %v645_v49 }
 0x1f2   :  { %v1302_v54 = vpop.eup %1301  ;;  %v782_v55 = vadd.f32 1.0, %v1300_v52  ;;  %1321 = vpow2.f32 %v951_v44  ;;  %v660_v57 = vadd.f32 %v1170_v53, %v1603_v29  ;;  %v654_v58 = vpop.f32.mrb[25].mxu1 }
 0x1f3   :  { %v1304_v60 = vpop.eup %1303  ;;  %v781_v61 = vadd.f32 1.0, %v1302_v54  ;;  %1323 = vpow2.f32 %v954_v51  ;;  %v655_v62 = vadd.f32 %v1603_v29, %v654_v58 }
 0x1f4   :  { %v1306_v63 = vpop.eup %1305  ;;  %872 = vst [vmem:[%s1738_s5 + $0x88] sm:$0xff] %v1304_v60  ;;  %1325 = vrcp.f32 %v782_v55  ;;  %v956_v0 = vmul.f32 -1.442695, %v660_v57 }
 0x1f5   :  { %v1308_v1 = vpop.eup %1307  ;;  %871 = vst [vmem:[%s1738_s5 + $0x80] sm:$0xff] %v1306_v63  ;;  %1327 = vrcp.f32 %v781_v61  ;;  %v955_v4 = vmul.f32 -1.442695, %v655_v62 }
 0x1f6   :  { %v1310_v2 = vpop.eup %1309  ;;  %v784_v3 = vadd.f32 1.0, %v1308_v1  ;;  %1329 = vpow2.f32 %v953_v56 }
 0x1f7   :  { %v1312_v5 = vpop.eup %1311  ;;  %v783_v6 = vadd.f32 1.0, %v1310_v2  ;;  %1331 = vpow2.f32 %v956_v0 }
 0x1f8   :  { %v1314_v29 = vpop.eup %1313  ;;  %874 = vst [vmem:[%s1738_s5 + $0x98] sm:$0xff] %v1312_v5  ;;  %1333 = vrcp.f32 %v784_v3 }
 0x1f9   :  { %v1316_v7 = vpop.eup %1315  ;;  %1335 = vrcp.f32 %v783_v6  ;;  %v786_v8 = vadd.f32 1.0, %v1314_v29 }
 0x1fa   :  { %v1318_v9 = vpop.eup %1317  ;;  %873 = vst [vmem:[%s1738_s5 + $0x90] sm:$0xff] %v1316_v7  ;;  %1337 = vpow2.f32 %v955_v4 }
 0x1fb   :  { %v1320_v10 = vpop.eup %1319  ;;  %876 = vst [vmem:[%s1738_s5 + $0xa8] sm:$0xff] %v1318_v9  ;;  %1339 = vrcp.f32 %v786_v8 }
 0x1fc   :  { %v1322_v11 = vpop.eup %1321  ;;  %875 = vst [vmem:[%s1738_s5 + $0xa0] sm:$0xff] %v1320_v10 }
 0x1fd   :  { %v1324_v12 = vpop.eup %1323  ;;  %v785_v13 = vadd.f32 1.0, %v1322_v11 }
 0x1fe   :  { %v1326_v14 = vpop.eup %1325  ;;  %v788_v15 = vadd.f32 1.0, %v1324_v12 }
 0x1ff   :  { %v1328_v16 = vpop.eup %1327  ;;  %878 = vst [vmem:[%s1738_s5 + $0xb8] sm:$0xff] %v1326_v14  ;;  %1341 = vrcp.f32 %v785_v13 }
 0x200   :  { %v1330_v17 = vpop.eup %1329  ;;  %877 = vst [vmem:[%s1738_s5 + $0xb0] sm:$0xff] %v1328_v16  ;;  %1343 = vrcp.f32 %v788_v15 }
 0x201   :  { %v1332_v18 = vpop.eup %1331  ;;  %v787_v19 = vadd.f32 1.0, %v1330_v17 }
 0x202   :  { %v1334_v20 = vpop.eup %1333  ;;  %v790_v21 = vadd.f32 1.0, %v1332_v18 }
 0x203   :  { %v1336_v22 = vpop.eup %1335  ;;  %880 = vst [vmem:[%s1738_s5 + $0xc8] sm:$0xff] %v1334_v20  ;;  %1345 = vrcp.f32 %v787_v19 }
 0x204   :  { %v1338_v23 = vpop.eup %1337  ;;  %879 = vst [vmem:[%s1738_s5 + $0xc0] sm:$0xff] %v1336_v22  ;;  %1347 = vrcp.f32 %v790_v21 }
 0x205   :  { %v1340_v24 = vpop.eup %1339  ;;  %v789_v25 = vadd.f32 1.0, %v1338_v23 }
 0x206   :  { %882 = vst [vmem:[%s1738_s5 + $0xd8] sm:$0xff] %v1340_v24 }
 0x207   :  { %1349 = vrcp.f32 %v789_v25 }
 0x209   :  { %v1342_v26 = vpop.eup %1341 }
 0x20a   :  { %v1344_v27 = vpop.eup %1343  ;;  %881 = vst [vmem:[%s1738_s5 + $0xd0] sm:$0xff] %v1342_v26 }
 0x20b   :  { %884 = vst [vmem:[%s1738_s5 + $0xe8] sm:$0xff] %v1344_v27 }
 0x20d   :  { %v1346_v28 = vpop.eup %1345 }
 0x20e   :  { %v1348_v30 = vpop.eup %1347  ;;  %883 = vst [vmem:[%s1738_s5 + $0xe0] sm:$0xff] %v1346_v28 }
 0x20f   :  { %886 = vst [vmem:[%s1738_s5 + $0xf8] sm:$0xff] %v1348_v30 }
 0x211   :  { %v1350_v31 = vpop.eup %1349 }
 0x212   :  { %885 = vst [vmem:[%s1738_s5 + $0xf0] sm:$0xff] %v1350_v31 }

</bundles_post_ra>
